<compile_context>
chip_gen: v7x
topology: tpu7x:2x2x1
jax: 0.10.0
libtpu: 0.0.40
codegen_flags: <defaults>
</compile_context>

<pallas_src>
import functools

import jax
import jax.numpy as jnp
from jax.experimental import pallas as pl
from jax.experimental.pallas import tpu as pltpu


# --------------------------------------------------------------------------
# Kernels
# --------------------------------------------------------------------------
def _embed_kernel(x_ref, w_ref, b_ref, o_ref, *, batch, dp):
    """x_ref: (B, tt, C); w_ref: (C, Dp); b_ref: (1, Dp) f32; o_ref: (tt, B*Dp)."""
    w = w_ref[...]
    bias = b_ref[...]                      # float32, broadcasts over rows
    for b in range(batch):                 # static unroll over the batch
        xt = x_ref[b]                      # (tt, C)
        if xt.dtype != w.dtype:
            xt = xt.astype(w.dtype)
        acc = jnp.dot(xt, w, preferred_element_type=jnp.float32) + bias
        o_ref[:, b * dp:(b + 1) * dp] = acc.astype(o_ref.dtype)


def _embed_kernel_dtiled(x_ref, w_ref, b_ref, o_ref):
    """x_ref: (tt, C) (B squeezed); w_ref: (C, td); b_ref: (1, td); o_ref: (tt, td)."""
    xt = x_ref[...]
    w = w_ref[...]
    if xt.dtype != w.dtype:
        xt = xt.astype(w.dtype)
    acc = jnp.dot(xt, w, preferred_element_type=jnp.float32) + b_ref[...]
    o_ref[...] = acc.astype(o_ref.dtype)


# --------------------------------------------------------------------------
# Tiling helpers
# --------------------------------------------------------------------------
def _sublane_align(itemsize):
    return {4: 8, 2: 16, 1: 32}.get(itemsize, 8)


@functools.lru_cache(maxsize=None)
def _hw_vmem_budget_bytes():
    """~3/4 of physical VMEM: ~96 MiB on v5e/v6e (128 MiB), ~48 MiB on v7x (64 MiB)."""
    try:
        cap = int(pltpu.get_tpu_info().vmem_capacity_bytes)
        if cap <= 0:
            raise ValueError("bad vmem capacity")
    except Exception:
        cap = 64 * 1024 * 1024             # conservative v7x-safe fallback
    return (cap * 3) // 4


def _pick_row_tile(requested, total, align, upper):
    """Largest legal row tile <= min(requested, upper, total), sublane aligned."""
    t = min(requested, total, max(upper, align))
    if t >= total:
        return total                        # full-dim block is always legal
    return min(total, max(align, (t // align) * align))


def _split_for_two_steps(tt, total, align):
    """Ensure >=2 grid steps along T when possible (keeps both v7x TCs busy)."""
    if tt < total:
        return tt                           # already >= 2 blocks
    half = -(-total // 2)                   # ceil(total / 2)
    half = -(-half // align) * align        # round up to sublane alignment
    return half if half < total else tt


# --------------------------------------------------------------------------
# Parameter prep (one-time; hoists the weight transpose / pad / cast)
# --------------------------------------------------------------------------
def prepare_embed_latent_params(weight, bias, compute_dtype=jnp.float32):
    """weight: (D, C) nn.Linear weight; bias: (D,).  Returns (w_t, b_row).

    w_t:   (C, Dp) transposed weight, zero-padded so Dp is a multiple of 128.
    b_row: (1, Dp) float32 bias (kept f32 end-to-end), zero-padded.
    """
    d, _ = weight.shape
    w_t = jnp.asarray(weight).T.astype(compute_dtype)         # (C, D)
    b_row = jnp.asarray(bias).astype(jnp.float32).reshape(1, d)
    dp = -(-d // 128) * 128
    if dp != d:
        w_t = jnp.pad(w_t, ((0, 0), (0, dp - d)))
        b_row = jnp.pad(b_row, ((0, 0), (0, dp - d)))
    return w_t, b_row


# --------------------------------------------------------------------------
# Forward
# --------------------------------------------------------------------------
@functools.partial(jax.jit,
                   static_argnames=("latent_dim", "row_tile", "tile_budget_bytes"))
def embed_latent(x, w_t, b_row, latent_dim, row_tile=1024, tile_budget_bytes=None):
    """EmbedLatent forward.

    x:      (B, T, C) activations (PyTorch layout)
    w_t:    (C, Dp)   pre-transposed / padded weight (prepare_embed_latent_params)
    b_row:  (1, Dp)   float32 bias row
    returns (T, B, latent_dim) == nn.Linear(C, D)(rearrange(x, 'b t c -> t b c'))
    """
    B, T, C = x.shape
    Cw, Dp = w_t.shape
    assert Cw == C and b_row.shape == (1, Dp) and Dp >= latent_dim

    x_size = jnp.dtype(x.dtype).itemsize
    w_size = jnp.dtype(w_t.dtype).itemsize
    align = _sublane_align(x_size)

    vmem_limit = int(_hw_vmem_budget_bytes())
    budget = int(tile_budget_bytes) if tile_budget_bytes else vmem_limit

    weight_bytes = C * Dp * w_size
    cost = pl.CostEstimate(
        flops=2 * B * T * C * Dp,
        transcendentals=0,
        bytes_accessed=(B * T * C + B * T * Dp) * x_size + weight_bytes + 4 * Dp,
    )
    cparams = lambda sem: pltpu.CompilerParams(      # noqa: E731
        dimension_semantics=sem, vmem_limit_bytes=vmem_limit)

    # Row-tile upper bound for the resident-weight path: double-buffered x and
    # out blocks + (conservatively double-buffered) resident weight.
    tt_upper = (budget - 2 * weight_bytes - 65536) // max(1, 2 * B * (C + Dp) * x_size)
    use_dtiled = (weight_bytes > budget // 3) or (tt_upper < align)

    if not use_dtiled:
        # ------------------------------------------------------------------
        # Fast path: 1-D grid over T tiles, B folded into the block, weight
        # resident in VMEM, one contiguous lane-dense (tt, B*Dp) store/step.
        # ------------------------------------------------------------------
        tt = _pick_row_tile(row_tile, T, align, tt_upper)
        tt = _split_for_two_steps(tt, T, align)
        grid = (pl.cdiv(T, tt),)

        y_flat = pl.pallas_call(
            functools.partial(_embed_kernel, batch=B, dp=Dp),
            out_shape=jax.ShapeDtypeStruct((T, B * Dp), x.dtype),
            grid_spec=pltpu.PrefetchScalarGridSpec(
                num_scalar_prefetch=0,
                grid=grid,
                in_specs=[
                    pl.BlockSpec((B, tt, C), lambda ti: (0, ti, 0)),
                    pl.BlockSpec((C, Dp), lambda ti: (0, 0)),   # VMEM-resident
                    pl.BlockSpec((1, Dp), lambda ti: (0, 0)),   # VMEM-resident
                ],
                out_specs=pl.BlockSpec((tt, B * Dp), lambda ti: (ti, 0)),
            ),
            compiler_params=cparams(("parallel",)),
            cost_estimate=cost,
        )(x, w_t, b_row)
    else:
        # ------------------------------------------------------------------
        # Large-weight path: stream (C, td) weight tiles; grid (T tiles, B,
        # D tiles).  Output blocks stay lane-dense (td multiple of 128).
        # ------------------------------------------------------------------
        td = 0
        cand = max(128, (min(Dp, 2048) // 128) * 128)
        while cand >= 128:
            if Dp % cand == 0 and 2 * C * cand * w_size <= budget:
                td = cand
                break
            cand -= 128
        if td == 0:
            td = 128                                    # minimal legal tile
        n_d = Dp // td

        fixed = 2 * (C * td * w_size + td * 4)
        tt_upper_d = (budget - fixed) // max(1, 2 * (C + td) * x_size)
        tt = _pick_row_tile(row_tile, T, align, tt_upper_d)
        grid = (pl.cdiv(T, tt), B, n_d)

        y_flat = pl.pallas_call(
            _embed_kernel_dtiled,
            out_shape=jax.ShapeDtypeStruct((T, B * Dp), x.dtype),
            grid_spec=pltpu.PrefetchScalarGridSpec(
                num_scalar_prefetch=0,
                grid=grid,
                in_specs=[
                    # Leading batch dim squeezed out -> kernel sees (tt, C).
                    pl.BlockSpec((None, tt, C), lambda ti, b, dj: (b, ti, 0)),
                    pl.BlockSpec((C, td), lambda ti, b, dj: (0, dj)),
                    pl.BlockSpec((1, td), lambda ti, b, dj: (0, dj)),
                ],
                out_specs=pl.BlockSpec(
                    (tt, td),
                    lambda ti, b, dj, _nd=n_d: (ti, b * _nd + dj)),
            ),
            compiler_params=cparams(("parallel", "parallel", "parallel")),
            cost_estimate=cost,
        )(x, w_t, b_row)

    y = y_flat.reshape(T, B, Dp)            # free: row-major split of last dim
    if Dp != latent_dim:
        y = y[:, :, :latent_dim]            # contiguous slice (padded cols only)
    return y


def _reference(x, weight, bias):
    # out[t, b, :] = x[b, t, :] @ weight.T + bias
    return jnp.einsum("btc,dc->tbd", x, weight) + bias


# --------------------------------------------------------------------------
# Self-test
# --------------------------------------------------------------------------
if __name__ == "__main__":
    key = jax.random.PRNGKey(0)

    cases = [
        # (B, T, input_feats, latent_dim, row_tile, tile_budget_bytes)
        (2, 16, 32, 128, 1024, None),        # fast path, T split into 2 tiles
        (2, 20, 32, 128, 8, None),           # fast path, 3 tiles incl. ragged tail
        (2, 8, 32, 64, 1024, None),          # latent_dim padded 64 -> 128 + slice
        (2, 16, 32, 256, 1024, 48 * 1024),   # forced weight-streaming (D-tiled) path
    ]

    for idx, (B, T, C, D, row_tile, tile_budget) in enumerate(cases):
        key, kx, kw, kb = jax.random.split(key, 4)
        x = jax.random.normal(kx, (B, T, C), dtype=jnp.float32)
        weight = jax.random.normal(kw, (D, C), jnp.float32) * 0.02
        bias = jax.random.normal(kb, (D,), jnp.float32) * 0.01

        w_t, b_row = prepare_embed_latent_params(weight, bias)   # one-time prep
        y = embed_latent(x, w_t, b_row, D, row_tile=row_tile,
                         tile_budget_bytes=tile_budget)
        y = jax.block_until_ready(y)

        ref = _reference(x, weight, bias)
        assert y.shape == (T, B, D), (idx, y.shape)
        assert jnp.allclose(y, ref, atol=1e-3, rtol=1e-3), (
            f"case {idx} mismatch, max err "
            f"{float(jnp.max(jnp.abs(y - ref)))}")

    print("KERNEL_OK")
</pallas_src>

<mosaic_0001>
module attributes {stable_mosaic.version = 11 : i64} {
  func.func @_embed_kernel(%arg0: i32, %arg1: memref<2x8x32xf32, #tpu.memory_space<vmem>>, %arg2: memref<32x128xf32, #tpu.memory_space<vmem>>, %arg3: memref<1x128xf32, #tpu.memory_space<vmem>>, %arg4: memref<8x256xf32, #tpu.memory_space<vmem>>) attributes {dimension_semantics = [#tpu.dimension_semantics<parallel>], iteration_bounds = array<i64: 2>, scalar_prefetch = 0 : i64, scratch_operands = 0 : i64, tpu.core_type = #tpu.core_type<tc>, window_params = [{transform_indices = @transform_0, window_bounds = array<i64: 2, 8, 32>}, {pipeline_mode = #tpu.pipeline_mode<synchronous>, transform_indices = @transform_1, window_bounds = array<i64: 32, 128>}, {pipeline_mode = #tpu.pipeline_mode<synchronous>, transform_indices = @transform_2, window_bounds = array<i64: 1, 128>}, {transform_indices = @transform_3, window_bounds = array<i64: 8, 256>}]} {
    %c0 = arith.constant 0 : index
    %c0_0 = arith.constant 0 : index
    %0 = vector.load %arg2[%c0, %c0_0] : memref<32x128xf32, #tpu.memory_space<vmem>>, vector<32x128xf32>
    %c0_1 = arith.constant 0 : index
    %c0_2 = arith.constant 0 : index
    %1 = vector.load %arg3[%c0_1, %c0_2] : memref<1x128xf32, #tpu.memory_space<vmem>>, vector<1x128xf32>
    %c0_3 = arith.constant 0 : index
    %c0_4 = arith.constant 0 : index
    %c0_5 = arith.constant 0 : index
    %2 = vector.load %arg1[%c0_3, %c0_4, %c0_5] : memref<2x8x32xf32, #tpu.memory_space<vmem>>, vector<1x8x32xf32>
    %3 = vector.shape_cast %2 : vector<1x8x32xf32> to vector<8x32xf32>
    %cst = arith.constant dense<0.000000e+00> : vector<8x128xf32>
    %4 = tpu.matmul %3, %0, %cst {dimension_numbers = #tpu.dot_dimension_numbers<[1], [0], [0], [1], [0, 0, 1, 1], [], []>} : vector<8x32xf32>, vector<32x128xf32>, vector<8x128xf32> -> vector<8x128xf32>
    %5 = vector.broadcast %1 : vector<1x128xf32> to vector<8x128xf32>
    %6 = arith.addf %4, %5 : vector<8x128xf32>
    %c0_6 = arith.constant 0 : index
    %c0_7 = arith.constant 0 : index
    %7 = vector.load %arg4[%c0_6, %c0_7] : memref<8x256xf32, #tpu.memory_space<vmem>>, vector<8x128xf32>
    tpu.vector_store %arg4[%c0_6, %c0_7], %6 {strides = array<i32>} : memref<8x256xf32, #tpu.memory_space<vmem>>, vector<8x128xf32>,
    %c1 = arith.constant 1 : index
    %c0_8 = arith.constant 0 : index
    %c0_9 = arith.constant 0 : index
    %8 = vector.load %arg1[%c1, %c0_8, %c0_9] : memref<2x8x32xf32, #tpu.memory_space<vmem>>, vector<1x8x32xf32>
    %9 = vector.shape_cast %8 : vector<1x8x32xf32> to vector<8x32xf32>
    %cst_10 = arith.constant dense<0.000000e+00> : vector<8x128xf32>
    %10 = tpu.matmul %9, %0, %cst_10 {dimension_numbers = #tpu.dot_dimension_numbers<[1], [0], [0], [1], [0, 0, 1, 1], [], []>} : vector<8x32xf32>, vector<32x128xf32>, vector<8x128xf32> -> vector<8x128xf32>
    %11 = vector.broadcast %1 : vector<1x128xf32> to vector<8x128xf32>
    %12 = arith.addf %10, %11 : vector<8x128xf32>
    %c0_11 = arith.constant 0 : index
    %c128 = arith.constant 128 : index
    %13 = vector.load %arg4[%c0_11, %c128] : memref<8x256xf32, #tpu.memory_space<vmem>>, vector<8x128xf32>
    tpu.vector_store %arg4[%c0_11, %c128], %12 {strides = array<i32>} : memref<8x256xf32, #tpu.memory_space<vmem>>, vector<8x128xf32>,
    return
  }
  func.func @transform_0(%arg0: i32) -> (i32, i32, i32) {
    %c0_i32 = arith.constant 0 : i32
    %c0_i32_0 = arith.constant 0 : i32
    %c0_i32_1 = arith.constant 0 : i32
    return %c0_i32, %arg0, %c0_i32_0 : i32, i32, i32
  }
  func.func @transform_1(%arg0: i32) -> (i32, i32) {
    %c0_i32 = arith.constant 0 : i32
    %c0_i32_0 = arith.constant 0 : i32
    %c0_i32_1 = arith.constant 0 : i32
    return %c0_i32, %c0_i32_0 : i32, i32
  }
  func.func @transform_2(%arg0: i32) -> (i32, i32) {
    %c0_i32 = arith.constant 0 : i32
    %c0_i32_0 = arith.constant 0 : i32
    %c0_i32_1 = arith.constant 0 : i32
    return %c0_i32, %c0_i32_0 : i32, i32
  }
  func.func @transform_3(%arg0: i32) -> (i32, i32) {
    %c0_i32 = arith.constant 0 : i32
    %c0_i32_0 = arith.constant 0 : i32
    return %arg0, %c0_i32 : i32, i32
  }
}

</mosaic_0001>

<bundles_post_ra>
// kernel: embed_latent.1
= control target key start
LH: loop header
LB: loop body
LE: loop exit
PB: predicated region body
PF: predicated region fallthrough
CT: control target
= control target key end

     0   :  { %8 = vsyncpa [#allocation3], 0  ;;  %s845_s0 = inlined_call_operand.hbm [shape: f32[2,16,32], index: 0, kind: input, shape index: {}]   ;;  %s846_s1 = inlined_call_operand.hbm [shape: f32[32,128], index: 1, kind: input, shape index: {}]   ;;  %s847_s2 = inlined_call_operand.vmem [shape: f32[1,128], index: 2, kind: input, shape index: {}]   ;;  %s848_s3 = inlined_call_operand.vmem [shape: f32[16,256], index: 3, kind: output, shape index: {}]  }
   0x1   :  { %10 = vsyncpa [#allocation3 + $0x1], 0 }
   0x2   :  { %11 = vsyncpa [#allocation5], 0  ;;  %s689_s12 = smov 0   ;;  %s691_s13 = smov 0  }
   0x3   :  { %s693_s14 = smov 0   ;;  %s695_s15 = smov 0  }
   0x4 LB: > { %s708_s16 = sadd.s32 4294967295, %s659_s15   ;;  %s711_s17 = sadd.s32 1, %s659_s15   ;;  %s659_s15 = sphi %s695_s15, %s866_s15   ;;  %s655_s14 = sphi %s693_s14, %s865_s14   ;;  %s651_s13 = sphi %s691_s13, %s864_s13   ;;  %s647_s12 = sphi %s689_s12, %s863_s12  }
   0x5   : > { %s21_s18 = ssub.s32 %s659_s15, %s711_s17  ;;  %s24_s19 = sadd.s32 1, %s655_s14 }
   0x6   : > { %p22_p0 = scmp.eq.s32.totalorder %s21_s18, 0  ;;  %p31_p1 = scmp.ne.s32.totalorder %s655_s14, %s651_s13 }
   0x7   : > { %p32_p2 = scmp.eq.s32.totalorder %s659_s15, 0  ;;  %p37_p3 = scmp.ne.s32.totalorder %s651_s13, %s647_s12 }
   0x8   : > { %s721_s20 = scalar_select %p22_p0, %s655_s14, %s24_s19  }
   0x9   : > { %p723_p4 = por %p32_p2, %p31_p1  ;;  %p849_p5 = scmp.eq.s32.totalorder %s708_s16, 0 }
   0xa   : > { %p446_p6 = scmp.ge.s32.totalorder %s659_s15, 1  ;;  %p116_p7 = scmp.lt.s32.totalorder %s659_s15, 3 }
   0xb   : > { %p732_p8 = por %p849_p5, %p37_p3  ;;  %s661_s24 = smov [#allocation4]  }
   0xc   : > { %p736_p9 = pnand %p446_p6, %p116_p7  ;;  %s128_s25 = sshll.u32 %s661_s24, 4  ;;  %s129_s25 = int_to_ptr.vmem [resolvable:$true] %s128_s25 }
   0xd   : > { %s854_s22 = scalar_select %p732_p8, 1, 0 }
   0xe   : > { %s855_s23 = scalar_select %p736_p9, 1, 0 }
   0xf   : > { %p513_p10 = pneg %p736_p9  ;;  %p522_p12 = scmp.lt.s32.totalorder %s659_s15, 2 }
  0x10   : > { %s145_s27 = sand.u32 1, %s655_s14   ;;  %s450_s28 = sshll.u32 %s659_s15, 7 }
  0x11   : > { %p744_p11 = pnand %p513_p10, %p849_p5  ;;  %p753_p13 = pnand %p522_p12, %p723_p4 }
  0x12   : > { %s563_s5 = scalar_lea.hbm %s846_s1, 512 }
  0x13   : > { %s857_s29 = scalar_select %p753_p13, 1, 0 }
  0x14   : > { %p564_p0 = scmp.ne.s32.totalorder %s846_s1, %s563_s5  ;;  %p565_p1 = pneg %p744_p11 }
  0x15   : > { %p570_p6 = scmp.lt.u32.totalorder %s563_s5, %s846_s1 }
  0x16   : > { %p566_p2 = pnand %p565_p1, %p564_p0 }
  0x18   : > { %p567_p3 = pneg %p566_p2 }
  0x1a   : > { %p572_p4 = pnand %p570_p6, %p567_p3 }
  0x1c   : > { %575 = shalt.err (!%p572_p4)
}
  0x1d   : > { %s576_s10 = scalar_lea.vmem %s129_s25, 512  ;;  %p584_p5 = scmp.lt.s32.totalorder %s129_s25, %s129_s25 }
  0x1e   : > { %p577_p7 = scmp.ne.s32.totalorder %s129_s25, %s576_s10  ;;  %p585_p8 = scmp.lt.s32.totalorder %s576_s10, %s576_s10 }
  0x20   : > { %p579_p10 = pnand %p577_p7, %p565_p1  ;;  %p586_p9 = por %p585_p8, %p584_p5 }
  0x22   : > { %p580_p12 = pneg %p579_p10 }
  0x24   : > { %p587_p13 = pnand %p586_p9, %p580_p12 }
  0x26   : > { %590 = shalt.err (!%p587_p13)
}
  0x27   : > { %s662_s11 = smov 128   ;;  %s663_s12 = smov 8  }
  0x28   : > { %516 = dma.hbm_to_vmem [thread:$0]  (!%p744_p11), %s846_s1, 512, %s129_s25, [#allocation5], %s662_s11, %s662_s11, %s663_s12  }
  0x29   : > { %s449_s19 = sshll.u32 %s145_s27, 4  ;;  %s779_s30 = scalar_lea.hbm %s845_s0, %s450_s28 }
  0x2a   : > { %s149_s4 = scalar_lea.vmem [#allocation2], %s449_s19  ;;  %s783_s26 = scalar_lea.sflag [#allocation3], %s145_s27 }
  0x2b   : > { %s155_s5 = sshll.u32 %s149_s4, 4  ;;  %s591_s6 = scalar_lea.hbm %s779_s30, 256  ;;  %s781_s5 = int_to_ptr.vmem [resolvable:$true] %s155_s5 }
  0x2c   : > { %p592_p5 = scmp.ne.s32.totalorder %s779_s30, %s591_s6  ;;  %p858_p8 = scmp.ne.s32.totalorder %s857_s29, 0 }
  0x2d   : > { %s596_s7 = scalar_lea.hbm %s845_s0, 512  ;;  %p597_p0 = scmp.lt.u32.totalorder %s779_s30, %s845_s0 }
  0x2e   : > { %p593_p9 = pneg %p858_p8  ;;  %p598_p1 = scmp.lt.u32.totalorder %s596_s7, %s591_s6 }
  0x2f   : > { %p600_p3 = scmp.lt.u32.totalorder %s591_s6, %s779_s30 }
  0x30   : > { %p594_p11 = pnand %p593_p9, %p592_p5  ;;  %p599_p2 = por %p598_p1, %p597_p0 }
  0x32   : > { %p595_p13 = pneg %p594_p11  ;;  %p601_p6 = por %p600_p3, %p599_p2 }
  0x34   : > { %p602_p4 = pnand %p601_p6, %p595_p13 }
  0x36   : > { %605 = shalt.err (!%p602_p4)
}
  0x37   : > { %s606_s27 = scalar_lea.vmem %s781_s5, 256  ;;  %s664_s10 = smov [#allocation2]  }
  0x38   : > { %p607_p7 = scmp.ne.s32.totalorder %s781_s5, %s606_s27  ;;  %s611_s15 = sshll.u32 %s664_s10, 4  ;;  %s612_s15 = int_to_ptr.vmem [resolvable:$false] %s611_s15 }
  0x39   : > { %s613_s18 = scalar_lea.vmem %s612_s15, 512  ;;  %p614_p5 = scmp.lt.s32.totalorder %s781_s5, %s612_s15 }
  0x3a   : > { %p609_p10 = pnand %p607_p7, %p593_p9  ;;  %p615_p11 = scmp.lt.s32.totalorder %s613_s18, %s606_s27 }
  0x3c   : > { %p610_p12 = pneg %p609_p10  ;;  %p616_p0 = por %p615_p11, %p614_p5 }
  0x3e   : > { %p617_p1 = pnand %p616_p0, %p610_p12 }
  0x40   : > { %620 = shalt.err (!%p617_p1)
}
  0x41   : > { %s665_s19 = smov 256   ;;  %p859_p9 = scmp.ne.s32.totalorder %s855_s23, 0 }
  0x42   : > { %520 = dma.hbm_to_vmem [thread:$0]  (!%p858_p8), %s779_s30, 256, %s781_s5, %s783_s26, %s665_s19, %s662_s11, %s663_s12  }
  0x43   : > { %167 = sbr.rel (%p859_p9) target bundleno = 303 (0x12f), region = 32  ;;  %s169_s21 = sand.u32 (!%p859_p9), 1, %s651_s13  }
  0x44   : > { %s452_s24 = sshll.u32 (!%p859_p9), %s169_s21, 4  ;;  %s170_s4 = scalar_lea.sflag (!%p859_p9), [#allocation3], %s169_s21 }
  0x45   : > { %s173_s6 = scalar_lea.vmem (!%p859_p9), [#allocation2], %s452_s24  ;;  %p860_p13 = scmp.ne.s32.totalorder (!%p859_p9), %s854_s22, 0 }
  0x4a   : > { %638 = dma.done.wait (%p860_p13), %s170_s4, 256  }
  0x4b   : > { %640 = vsyncadd (%p860_p13), %s170_s4, 4294967040  ;;  %p861_p2 = scmp.eq.s32.totalorder %s708_s16, 0 }
  0x4d   : > { %642 = dma.done.wait (%p861_p2), [#allocation5], 512   ;;  %p862_p3 = pmov %p861_p2 }
  0x4e   : > { %v666_v0 = vmov 0.0|0.0   ;;  %vm667_vm0 = vmmov 0   ;;  %v668_v1 = vmov 0.0   ;;  %v205_v2 = vld [vmem:[#allocation4] sm:$0xff]  ;;  %v206_v3 = vld [vmem:[#allocation4 + $0x8] sm:$0xff]  ;;  %v207_v4 = vld [vmem:[#allocation4 + $0x10] sm:$0xff] }
  0x4f   : > { %644 = vsyncadd (%p862_p3), [#allocation5], 4294966784  ;;  %495 = vmatprep.subr.bf16.mxu0 %v666_v0  ;;  %501 = vmatprep.subr.bf16.mxu1 %v666_v0  ;;  %v496_v5 = vpack.c.bf16 %v206_v3, %v205_v2  ;;  %v208_v6 = vld [vmem:[#allocation4 + $0x18] sm:$0xff]  ;;  %v210_v8 = vld [vmem:[%s173_s6] sm:$0xff]  ;;  %vm217_vm1 = vcmask 261120   ;;  %p200_p8 = scmp.lt.s32.totalorder %s708_s16, 1 }
  0x50   : > { %481 = vmatprep.mubr.msk.f32.mxu0 %vm667_vm0, %v668_v1  ;;  %492 = vmatprep.mubr.msk.f32.mxu1 %vm667_vm0, %v668_v1  ;;  %v499_v7 = vpack.c.bf16 %v208_v6, %v207_v4  ;;  %v458_v9 = vld [vmem:[%s173_s6 + $0x8] sm:$0xff]  ;;  %v456_v10 = vld [vmem:[%s847_s2] ss:$0 sm:$0xff] }
  0x51   : > { %497 = vmatpush3.bf16.msra.mxu0 %v496_v5  ;;  %503 = vmatpush3.bf16.msra.mxu1 %v496_v5  ;;  %s868_s16 = smov (!%p200_p8, %s708_s16), 1 }
  0x52   : > { %498 = vmatprep.subr.bf16.mxu0 %v666_v0  ;;  %504 = vmatprep.subr.bf16.mxu1 %v666_v0  ;;  %s462_s22 = sshll.u32 %s868_s16, 4 }
  0x53   : > { %s204_s30 = scalar_lea.vmem %s848_s3, %s462_s22 }
  0x55   : > { %500 = vmatpush3.bf16.msra.mxu0 %v499_v7  ;;  %506 = vmatpush3.bf16.msra.mxu1 %v499_v7 }
  0x58   : > { %482 = vmatmul.mubr.msk.f32.vlgmr.msra.gmra.mrb[0].mxu0 %vm217_vm1, %v210_v8  ;;  %493 = vmatmul.mubr.msk.f32.vlgmr.msra.gmra.mrb[0].mxu1 %vm217_vm1, %v458_v9 }
 0x12b   : > { %v287_v11 = vpop.f32.mrb[0].mxu0  ;;  %v363_v12 = vpop.f32.mrb[0].mxu1 }
 0x12c   : > { %v288_v13 = vadd.f32 %v456_v10, %v287_v11  ;;  %v364_v14 = vadd.f32 %v456_v10, %v363_v12  ;;  %v483_v15 = vpop.f32.mrb[1].mxu0  ;;  %v494_v16 = vpop.f32.mrb[1].mxu1 }
 0x12e   : > { %291 = vst [vmem:[%s204_s30] sm:$0xff] %v288_v13  ;;  %367 = vst [vmem:[%s204_s30 + $0x8] sm:$0xff] %v364_v14 }
 0x12f PF: > { %p14_p6 = scmp.ge.s32.totalorder %s711_s17, 4   ;;  %s863_s12 = smov %s651_s13 }
 0x130   : > { %s864_s13 = smov %s655_s14  ;;  %s865_s14 = smov %s721_s20 }
 0x131   : > { %s866_s15 = smov %s711_s17  ;;  %16 = sbr.rel (!%p14_p6) target bundleno = 4 (0x4), region = 77 }
 0x138   :  { %389 = vsyncpa [#allocation3], 1 }
 0x139   :  { %391 = vsyncpa [#allocation3 + $0x1], 1 }
 0x13a   :  { %392 = vsyncpa [#allocation5], 1 }

</bundles_post_ra>
